<compile_context>
chip_gen: v5e
topology: v5e:2x2
jax: 0.10.0
libtpu: 0.0.40
codegen_flags: <defaults>
</compile_context>

<pallas_src>
import functools

import jax
import jax.numpy as jnp
from jax import lax
from jax.experimental import pallas as pl
from jax.experimental.pallas import tpu as pltpu


def _s3ae_kernel(x_ref, w_enc_ref, w_dec_ref, xhat_ref, z_ref, yslab_ref,
                 *, yslab_width):
    x = x_ref[...]

    # Encoder: Z_pre = X @ We^T -- contract the feature axis of X with the
    # feature axis of We (no transposed weight copy needed).
    z_pre = lax.dot_general(
        x, w_enc_ref[...],
        dimension_numbers=(((1,), (1,)), ((), ())),
        preferred_element_type=jnp.float32)

    # Lane-dense pre-ReLU slab (>= label_dim wide); Y_hat slice happens in the
    # wrapper.  The slice start is 0, so it is lane-aligned and cheap.
    yslab_ref[...] = z_pre[:, :yslab_width].astype(yslab_ref.dtype)

    # ReLU latent.
    z = jnp.maximum(z_pre, 0.0)
    z_ref[...] = z.astype(z_ref.dtype)

    # Decoder: X_hat = relu(Z) @ Wd^T.  Cast the activation back to the input
    # dtype so bf16 runs hit native MXU throughput (no-op for f32).
    xhat_ref[...] = lax.dot_general(
        z.astype(x.dtype), w_dec_ref[...],
        dimension_numbers=(((1,), (1,)), ((), ())),
        preferred_element_type=jnp.float32).astype(xhat_ref.dtype)


def s3ae_forward(x, w_enc, w_dec, label_dim, *, batch_tile=256):
    """x: [B, input_dim]; w_enc: [hidden_dim, input_dim]; w_dec: [input_dim, hidden_dim]."""
    B, input_dim = x.shape
    hidden_dim = w_enc.shape[0]
    assert w_enc.shape == (hidden_dim, input_dim)
    assert w_dec.shape == (input_dim, hidden_dim)
    assert 0 < label_dim <= hidden_dim

    # Lane-dense width for the pre-ReLU label slab written by the kernel.
    yslab_width = min(hidden_dim, ((label_dim + 127) // 128) * 128)

    # Batch tile: whole batch when small, otherwise a fixed-row tile (keeps
    # per-step VMEM bounded and gives double-buffered prefetch; 128-256 rows
    # already saturate the MXU M dimension on all generations).
    tb = B if B <= batch_tile else batch_tile
    grid = (pl.cdiv(B, tb),)

    kernel = functools.partial(_s3ae_kernel, yslab_width=yslab_width)

    out_shapes = (
        jax.ShapeDtypeStruct((B, input_dim), x.dtype),    # X_hat
        jax.ShapeDtypeStruct((B, hidden_dim), x.dtype),   # Z (post-ReLU)
        jax.ShapeDtypeStruct((B, yslab_width), x.dtype),  # pre-ReLU slab
    )

    itemsize = jnp.dtype(x.dtype).itemsize
    cost = pl.CostEstimate(
        flops=2 * 2 * B * input_dim * hidden_dim,     # encoder + decoder matmul
        transcendentals=0,
        bytes_accessed=itemsize * (
            B * input_dim                   # X in
            + 2 * input_dim * hidden_dim    # both weight matrices
            + B * input_dim                 # X_hat out
            + B * hidden_dim                # Z out
            + B * yslab_width))             # pre-ReLU slab out

    x_hat, z, y_slab = pl.pallas_call(
        kernel,
        out_shape=out_shapes,
        grid_spec=pltpu.PrefetchScalarGridSpec(
            num_scalar_prefetch=0,
            grid=grid,
            in_specs=[
                pl.BlockSpec((tb, input_dim), lambda i: (i, 0)),
                # Constant index_map -> weights DMA'd once, VMEM-resident.
                pl.BlockSpec((hidden_dim, input_dim), lambda i: (0, 0)),
                pl.BlockSpec((input_dim, hidden_dim), lambda i: (0, 0)),
            ],
            out_specs=[
                pl.BlockSpec((tb, input_dim), lambda i: (i, 0)),
                pl.BlockSpec((tb, hidden_dim), lambda i: (i, 0)),
                pl.BlockSpec((tb, yslab_width), lambda i: (i, 0)),
            ],
        ),
        compiler_params=pltpu.CompilerParams(
            dimension_semantics=("parallel",)),   # megacore sharding on v7x
        cost_estimate=cost,
    )(x, w_enc, w_dec)

    # Exact Y_hat semantics: pre-ReLU slice of the latent code (free in XLA).
    y_hat = y_slab[:, :label_dim]
    return x_hat, z, y_hat


def s3ae_reference(x, w_enc, w_dec, label_dim):
    z_pre = x @ w_enc.T
    y_hat = z_pre[:, :label_dim]
    z = jnp.maximum(z_pre, 0.0)
    x_hat = z @ w_dec.T
    return x_hat, z, y_hat


if __name__ == "__main__":
    # Modest shapes: lane-friendly feature dims, batch large enough that the
    # grid actually tiles (grid=(2,) with the default 256-row batch tile).
    B, input_dim, hidden_dim, label_dim = 512, 256, 128, 16

    key = jax.random.PRNGKey(0)
    kx, ke, kd = jax.random.split(key, 3)

    x = jax.random.normal(kx, (B, input_dim), dtype=jnp.float32)
    # PyTorch Linear weight shapes (bias=False in the module):
    #   encoder.weight: [hidden_dim, input_dim], decoder.weight: [input_dim, hidden_dim]
    w_enc = jax.random.uniform(ke, (hidden_dim, input_dim), dtype=jnp.float32,
                               minval=-1.0, maxval=1.0) / jnp.sqrt(input_dim)
    w_dec = jax.random.uniform(kd, (input_dim, hidden_dim), dtype=jnp.float32,
                               minval=-1.0, maxval=1.0) / jnp.sqrt(hidden_dim)

    x_hat, z, y_hat = jax.block_until_ready(
        s3ae_forward(x, w_enc, w_dec, label_dim))

    # Correctness check against pure-JAX reference.
    x_hat_ref, z_ref, y_hat_ref = s3ae_reference(x, w_enc, w_dec, label_dim)
    assert x_hat.shape == x_hat_ref.shape
    assert z.shape == z_ref.shape
    assert y_hat.shape == y_hat_ref.shape
    assert jnp.allclose(x_hat, x_hat_ref, atol=1e-4, rtol=1e-4)
    assert jnp.allclose(z, z_ref, atol=1e-4, rtol=1e-4)
    assert jnp.allclose(y_hat, y_hat_ref, atol=1e-4, rtol=1e-4)

    print("KERNEL_OK")
</pallas_src>

<mosaic_0001>
module attributes {stable_mosaic.version = 11 : i64} {
  func.func @_s3ae_kernel(%arg0: i32, %arg1: memref<256x256xf32, #tpu.memory_space<vmem>>, %arg2: memref<128x256xf32, #tpu.memory_space<vmem>>, %arg3: memref<256x128xf32, #tpu.memory_space<vmem>>, %arg4: memref<256x256xf32, #tpu.memory_space<vmem>>, %arg5: memref<256x128xf32, #tpu.memory_space<vmem>>, %arg6: memref<256x128xf32, #tpu.memory_space<vmem>>) attributes {dimension_semantics = [#tpu.dimension_semantics<parallel>], iteration_bounds = array<i64: 2>, scalar_prefetch = 0 : i64, scratch_operands = 0 : i64, tpu.core_type = #tpu.core_type<tc>, window_params = [{transform_indices = @transform_0, window_bounds = array<i64: 256, 256>}, {pipeline_mode = #tpu.pipeline_mode<synchronous>, transform_indices = @transform_1, window_bounds = array<i64: 128, 256>}, {pipeline_mode = #tpu.pipeline_mode<synchronous>, transform_indices = @transform_2, window_bounds = array<i64: 256, 128>}, {transform_indices = @transform_3, window_bounds = array<i64: 256, 256>}, {transform_indices = @transform_4, window_bounds = array<i64: 256, 128>}, {transform_indices = @transform_5, window_bounds = array<i64: 256, 128>}]} {
    %c0 = arith.constant 0 : index
    %c0_0 = arith.constant 0 : index
    %0 = vector.load %arg1[%c0, %c0_0] : memref<256x256xf32, #tpu.memory_space<vmem>>, vector<256x256xf32>
    %c0_1 = arith.constant 0 : index
    %c0_2 = arith.constant 0 : index
    %1 = vector.load %arg2[%c0_1, %c0_2] : memref<128x256xf32, #tpu.memory_space<vmem>>, vector<128x256xf32>
    %cst = arith.constant dense<0.000000e+00> : vector<256x128xf32>
    %2 = tpu.matmul %0, %1, %cst {dimension_numbers = #tpu.dot_dimension_numbers<[1], [1], [0], [0], [0, 0, 1, 0], [], []>} : vector<256x256xf32>, vector<128x256xf32>, vector<256x128xf32> -> vector<256x128xf32>
    %c0_3 = arith.constant 0 : index
    %c0_4 = arith.constant 0 : index
    %3 = vector.load %arg6[%c0_3, %c0_4] : memref<256x128xf32, #tpu.memory_space<vmem>>, vector<256x128xf32>
    tpu.vector_store %arg6[%c0_3, %c0_4], %2 {strides = array<i32>} : memref<256x128xf32, #tpu.memory_space<vmem>>, vector<256x128xf32>,
    %cst_5 = arith.constant 0.000000e+00 : f32
    %4 = vector.broadcast %cst_5 : f32 to vector<256x128xf32>
    %5 = arith.maximumf %2, %4 : vector<256x128xf32>
    %c0_6 = arith.constant 0 : index
    %c0_7 = arith.constant 0 : index
    %6 = vector.load %arg5[%c0_6, %c0_7] : memref<256x128xf32, #tpu.memory_space<vmem>>, vector<256x128xf32>
    tpu.vector_store %arg5[%c0_6, %c0_7], %5 {strides = array<i32>} : memref<256x128xf32, #tpu.memory_space<vmem>>, vector<256x128xf32>,
    %c0_8 = arith.constant 0 : index
    %c0_9 = arith.constant 0 : index
    %7 = vector.load %arg3[%c0_8, %c0_9] : memref<256x128xf32, #tpu.memory_space<vmem>>, vector<256x128xf32>
    %cst_10 = arith.constant dense<0.000000e+00> : vector<256x256xf32>
    %8 = tpu.matmul %5, %7, %cst_10 {dimension_numbers = #tpu.dot_dimension_numbers<[1], [1], [0], [0], [0, 0, 1, 0], [], []>} : vector<256x128xf32>, vector<256x128xf32>, vector<256x256xf32> -> vector<256x256xf32>
    %c0_11 = arith.constant 0 : index
    %c0_12 = arith.constant 0 : index
    %9 = vector.load %arg4[%c0_11, %c0_12] : memref<256x256xf32, #tpu.memory_space<vmem>>, vector<256x256xf32>
    tpu.vector_store %arg4[%c0_11, %c0_12], %8 {strides = array<i32>} : memref<256x256xf32, #tpu.memory_space<vmem>>, vector<256x256xf32>,
    return
  }
  func.func @transform_0(%arg0: i32) -> (i32, i32) {
    %c0_i32 = arith.constant 0 : i32
    %c0_i32_0 = arith.constant 0 : i32
    return %arg0, %c0_i32 : i32, i32
  }
  func.func @transform_1(%arg0: i32) -> (i32, i32) {
    %c0_i32 = arith.constant 0 : i32
    %c0_i32_0 = arith.constant 0 : i32
    %c0_i32_1 = arith.constant 0 : i32
    return %c0_i32, %c0_i32_0 : i32, i32
  }
  func.func @transform_2(%arg0: i32) -> (i32, i32) {
    %c0_i32 = arith.constant 0 : i32
    %c0_i32_0 = arith.constant 0 : i32
    %c0_i32_1 = arith.constant 0 : i32
    return %c0_i32, %c0_i32_0 : i32, i32
  }
  func.func @transform_3(%arg0: i32) -> (i32, i32) {
    %c0_i32 = arith.constant 0 : i32
    %c0_i32_0 = arith.constant 0 : i32
    return %arg0, %c0_i32 : i32, i32
  }
  func.func @transform_4(%arg0: i32) -> (i32, i32) {
    %c0_i32 = arith.constant 0 : i32
    %c0_i32_0 = arith.constant 0 : i32
    return %arg0, %c0_i32 : i32, i32
  }
  func.func @transform_5(%arg0: i32) -> (i32, i32) {
    %c0_i32 = arith.constant 0 : i32
    %c0_i32_0 = arith.constant 0 : i32
    return %arg0, %c0_i32 : i32, i32
  }
}

</mosaic_0001>

<bundles_post_ra>
// kernel: tpu_custom_call.1
= control target key start
LH: loop header
LB: loop body
LE: loop exit
PB: predicated region body
PF: predicated region fallthrough
CT: control target
= control target key end

     0   :  { %11 = vsyncpa [#allocation3], 0  ;;  %s2033_s0 = inlined_call_operand.hbm [shape: f32[512,256], index: 0, kind: input, shape index: {}]   ;;  %s2034_s1 = inlined_call_operand.hbm [shape: f32[128,256], index: 1, kind: input, shape index: {}]   ;;  %s2035_s2 = inlined_call_operand.hbm [shape: f32[256,128], index: 2, kind: input, shape index: {}]   ;;  %s2036_s3 = inlined_call_operand.hbm [shape: f32[512,256], index: 3, kind: output, shape index: {0}]   ;;  %s2037_s4 = inlined_call_operand.hbm [shape: f32[512,128], index: 4, kind: output, shape index: {1}]   ;;  %s2038_s5 = inlined_call_operand.hbm [shape: f32[512,128], index: 5, kind: output, shape index: {2}]  }
   0x1   :  { %13 = vsyncpa [#allocation3 + $0x1], 0 }
   0x2   :  { %14 = vsyncpa [#allocation6], 0 }
   0x3   :  { %15 = vsyncpa [#allocation4], 0 }
   0x4   :  { %17 = vsyncpa [#allocation4 + $0x1], 0 }
   0x5   :  { %18 = vsyncpa [#allocation10], 0 }
   0x6   :  { %20 = vsyncpa [#allocation10 + $0x1], 0  ;;  %s1638_s18 = smov 0   ;;  %s1640_s19 = smov 0  }
   0x7   :  { %s1642_s20 = smov 0   ;;  %s1644_s21 = smov 0  }
   0x8 LB: > { %s1659_s22 = sadd.s32 4294967295, %s1596_s21   ;;  %s2039_s23 = sadd.s32 4294967294, %s1596_s21   ;;  %s1596_s21 = sphi %s1644_s21, %s2054_s21   ;;  %s1592_s20 = sphi %s1642_s20, %s2053_s20   ;;  %s1588_s19 = sphi %s1640_s19, %s2052_s19   ;;  %s1584_s18 = sphi %s1638_s18, %s2051_s18  }
   0x9   : > { %p46_p0 = scmp.ne.s32.totalorder %s1588_s19, %s1584_s18  ;;  %p47_p1 = scmp.eq.s32.totalorder %s1659_s22, 0 }
   0xa   : > { %p112_p2 = scmp.eq.s32.totalorder %s1659_s22, 1  ;;  %p118_p3 = scmp.eq.s32.totalorder %s2039_s23, 1 }
   0xb   : > { %p1670_p4 = por %p47_p1, %p46_p0  ;;  %p1258_p5 = scmp.ge.s32.totalorder %s1596_s21, 1 }
   0xc   : > { %p1675_p6 = por %p118_p3, %p46_p0  ;;  %p177_p7 = scmp.lt.s32.totalorder %s1596_s21, 3 }
   0xd   : > { %s188_s28 = sshll.u32 %s2034_s1, 4  ;;  %s1598_s30 = smov [#allocation5]   ;;  %s189_s28 = int_to_ptr.hbm [resolvable:$true] %s188_s28 }
   0xe   : > { %p1683_p8 = pnand %p1258_p5, %p177_p7  ;;  %s190_s6 = sshll.u32 %s1598_s30, 4  ;;  %s191_s6 = int_to_ptr.vmem [resolvable:$true] %s190_s6 }
   0xf   : > { %s202_s9 = sshll.u32 %s2035_s2, 4  ;;  %s2040_s10 = smov 256   ;;  %s203_s9 = int_to_ptr.hbm [resolvable:$true] %s202_s9 }
  0x10   : > { %p1307_p9 = pneg %p1683_p8  ;;  %s1600_s11 = smov 16  }
  0x11   : > { %s1601_s12 = smov [#allocation7]   ;;  %s1602_s14 = smov 128  }
  0x12   : > { %p1308_p10 = pnand %p1307_p9, %p47_p1  ;;  %s204_s13 = sshll.u32 %s1601_s12, 4  ;;  %s205_s13 = int_to_ptr.vmem [resolvable:$true] %s204_s13 }
  0x13   : > { %s1603_s15 = smov 8   ;;  %s1699_s16 = sadd.s32 1, %s1596_s21  }
  0x14   : > { %1310 = dma.hbm_to_vmem [thread:$0]  (!%p1308_p10), %s189_s28, 4096, %s191_s6, [#allocation6], %s2040_s10, %s2040_s10, %s1600_s11  }
  0x15   : > { %1313 = dma.hbm_to_vmem [thread:$0]  (!%p1308_p10), %s203_s9, 4096, %s205_s13, [#allocation6], %s1602_s14, %s1602_s14, %s1603_s15  }
  0x16   : > { %s30_s17 = ssub.s32 %s1596_s21, %s1699_s16  ;;  %s33_s26 = sadd.s32 1, %s1592_s20 }
  0x17   : > { %p31_p12 = scmp.eq.s32.totalorder %s30_s17, 0  ;;  %p40_p13 = scmp.ne.s32.totalorder %s1592_s20, %s1588_s19 }
  0x18   : > { %p41_p0 = scmp.eq.s32.totalorder %s1596_s21, 0  ;;  %p1330_p7 = scmp.lt.s32.totalorder %s1596_s21, 2 }
  0x19   : > { %s1708_s27 = scalar_select %p31_p12, %s1592_s20, %s33_s26  }
  0x1a   : > { %p42_p3 = por %p41_p0, %p40_p13  ;;  %p1712_p5 = por %p112_p2, %p40_p13 }
  0x1b   : > { %s218_s30 = sand.u32 1, %s1592_s20   ;;  %s1286_s7 = sshll.u32 %s1596_s21, 9 }
  0x1c   : > { %s1262_s6 = sshll.u32 %s218_s30, 9  ;;  %s228_s12 = scalar_lea.hbm %s2033_s0, %s1286_s7 }
  0x1d   : > { %s222_s13 = scalar_lea.vmem [#allocation2], %s1262_s6  ;;  %s229_s15 = sshll.u32 %s228_s12, 4  ;;  %s230_s15 = int_to_ptr.hbm [resolvable:$true] %s229_s15 }
  0x1e   : > { %s231_s14 = sshll.u32 %s222_s13, 4  ;;  %p1722_p9 = pnand %p1330_p7, %p42_p3  ;;  %s232_s14 = int_to_ptr.vmem [resolvable:$true] %s231_s14 }
  0x1f   : > { %s219_s26 = scalar_lea.sflag [#allocation3], %s218_s30  ;;  %s1436_s23 = sshra.s32 %s230_s15, 4  ;;  %s1437_s23 = int_to_ptr.hbm [resolvable:$true] %s1436_s23 }
  0x20   : > { %s1438_s10 = scalar_lea.hbm %s1437_s23, 512  ;;  %p1440_p10 = pneg %p1722_p9 }
  0x21   : > { %p1439_p2 = scmp.ne.s32.totalorder %s1437_s23, %s1438_s10  ;;  %s1443_s8 = scalar_lea.hbm %s2033_s0, 1024 }
  0x22   : > { %p1444_p0 = scmp.lt.s32.totalorder %s1437_s23, %s2033_s0  ;;  %p1445_p3 = scmp.lt.s32.totalorder %s1443_s8, %s1438_s10 }
  0x23   : > { %p1441_p12 = pnand %p1440_p10, %p1439_p2 }
  0x24   : > { %p1446_p7 = por %p1445_p3, %p1444_p0 }
  0x25   : > { %p1442_p13 = pneg %p1441_p12 }
  0x27   : > { %p1447_p11 = pnand %p1446_p7, %p1442_p13 }
  0x29   : > { %1450 = shalt.err (!%p1447_p11)
}
  0x2a   : > { %s2047_s30 = smov 256   ;;  %243 = sbr.rel (%p1683_p8) target bundleno = 634 (0x27a), region = 32 }
  0x2b   : > { %1317 = dma.hbm_to_vmem [thread:$0]  (!%p1722_p9), %s230_s15, 8192, %s232_s14, %s219_s26, %s2047_s30, %s2047_s30, %s1600_s11  }
  0x2c   : > { %s1742_s13 = sand.u32 (!%p1683_p8), 1, %s1588_s19  }
  0x2d   : > { %s1267_s23 = sshll.u32 (!%p1683_p8), %s1742_s13, 9  ;;  %s246_s10 = scalar_lea.sflag (!%p1683_p8), [#allocation3], %s1742_s13 }
  0x2e   : > { %s1748_s7 = scalar_lea.vmem (!%p1683_p8), [#allocation2], %s1267_s23 }
  0x2f   : > { %1567 = dma.done.wait (%p1670_p4), %s246_s10, 8192  }
  0x30   : > { %1569 = vsyncadd (%p1670_p4), %s246_s10, 4294959104 }
  0x31   : > { %1571 = dma.done.wait (%p47_p1), [#allocation6], 8192  }
  0x32   : > { %1573 = vsyncadd (%p47_p1), [#allocation6], 4294959104  ;;  %v395_v0 = vld [vmem:[#allocation5 + $0xf0] sm:$0xff]  ;;  %v396_v1 = vld [vmem:[#allocation5 + $0xf8] sm:$0xff]  ;;  %s1271_s24 = sshll.u32 %s1742_s13, 8  ;;  %s1863_s14 = scalar_lea.vmem [#allocation8], %s1267_s23 }
  0x33   : > { %397 = vmatpush.xpose.msra.mxu0 %v395_v0  ;;  %510 = vmatpush.xpose.msra.mxu1 %v396_v1  ;;  %v393_v2 = vld [vmem:[#allocation5 + $0xe0] sm:$0xff]  ;;  %v394_v3 = vld [vmem:[#allocation5 + $0xe8] sm:$0xff]  ;;  %v391_v4 = vld [vmem:[#allocation5 + $0xd0] sm:$0xff]  ;;  %s1793_s29 = scalar_lea.vmem [#allocation11], %s1271_s24  ;;  %s1796_s11 = scalar_lea.vmem [#allocation9], %s1271_s24 }
  0x34   : > { %v392_v5 = vld [vmem:[#allocation5 + $0xd8] sm:$0xff]  ;;  %v389_v6 = vld [vmem:[#allocation5 + $0xc0] sm:$0xff]  ;;  %v390_v7 = vld [vmem:[#allocation5 + $0xc8] sm:$0xff]  ;;  %s2041_s15 = sshll.u32 %s1659_s22, 8  ;;  %s1046_s8 = sand.u32 1, %s1659_s22  }
  0x35   : > { %v387_v8 = vld [vmem:[#allocation5 + $0xb0] sm:$0xff]  ;;  %v388_v9 = vld [vmem:[#allocation5 + $0xb8] sm:$0xff]  ;;  %v385_v10 = vld [vmem:[#allocation5 + $0xa0] sm:$0xff]  ;;  %s1081_s6 = scalar_lea.hbm %s2037_s4, %s2041_s15  ;;  %s1082_s9 = sshll.u32 %s1796_s11, 4  ;;  %s1083_s9 = int_to_ptr.vmem [resolvable:$true] %s1082_s9 }
  0x36   : > { %v386_v11 = vld [vmem:[#allocation5 + $0xa8] sm:$0xff]  ;;  %v383_v12 = vld [vmem:[#allocation5 + $0x90] sm:$0xff]  ;;  %v384_v13 = vld [vmem:[#allocation5 + $0x98] sm:$0xff]  ;;  %s1084_s12 = sshll.u32 %s1081_s6, 4  ;;  %s1935_s30 = scalar_lea.sflag [#allocation10], %s1046_s8  ;;  %s1085_s12 = int_to_ptr.hbm [resolvable:$true] %s1084_s12 }
  0x37   : > { %398 = vmatpush.xpose.msra.mxu0 %v393_v2  ;;  %511 = vmatpush.xpose.msra.mxu1 %v394_v3  ;;  %v381_v14 = vld [vmem:[#allocation5 + $0x80] sm:$0xff]  ;;  %v382_v15 = vld [vmem:[#allocation5 + $0x88] sm:$0xff]  ;;  %v379_v16 = vld [vmem:[#allocation5 + $0x70] sm:$0xff]  ;;  %s1480_s23 = sshra.s32 %s1085_s12, 4  ;;  %s1486_s17 = scalar_lea.hbm %s2037_s4, 512  ;;  %s1481_s23 = int_to_ptr.hbm [resolvable:$true] %s1480_s23 }
  0x38   : > { %v380_v17 = vld [vmem:[#allocation5 + $0x78] sm:$0xff]  ;;  %v377_v18 = vld [vmem:[#allocation5 + $0x60] sm:$0xff]  ;;  %v378_v19 = vld [vmem:[#allocation5 + $0x68] sm:$0xff]  ;;  %s1482_s10 = scalar_lea.hbm %s1481_s23, 256  ;;  %p1487_p11 = scmp.lt.s32.totalorder %s1481_s23, %s2037_s4 }
  0x39   : > { %v375_v20 = vld [vmem:[#allocation5 + $0x50] sm:$0xff]  ;;  %v376_v21 = vld [vmem:[#allocation5 + $0x58] sm:$0xff]  ;;  %v373_v22 = vld [vmem:[#allocation5 + $0x40] sm:$0xff]  ;;  %p1483_p1 = scmp.ne.s32.totalorder %s1481_s23, %s1482_s10  ;;  %p1488_p9 = scmp.lt.s32.totalorder %s1486_s17, %s1482_s10 }
  0x3a   : > { %v374_v23 = vld [vmem:[#allocation5 + $0x48] sm:$0xff]  ;;  %v371_v24 = vld [vmem:[#allocation5 + $0x30] sm:$0xff]  ;;  %v372_v25 = vld [vmem:[#allocation5 + $0x38] sm:$0xff] }
  0x3b   : > { %399 = vmatpush.xpose.msra.mxu0 %v391_v4  ;;  %512 = vmatpush.xpose.msra.mxu1 %v392_v5  ;;  %v369_v26 = vld [vmem:[#allocation5 + $0x20] sm:$0xff]  ;;  %v370_v27 = vld [vmem:[#allocation5 + $0x28] sm:$0xff]  ;;  %v367_v28 = vld [vmem:[#allocation5 + $0x10] sm:$0xff]  ;;  %p1484_p4 = pnand %p1483_p1, %p1712_p5  ;;  %p1489_p2 = por %p1488_p9, %p1487_p11 }
  0x3c   : > { %v368_v29 = vld [vmem:[#allocation5 + $0x18] sm:$0xff]  ;;  %v365_v30 = vld [vmem:[#allocation5] sm:$0xff]  ;;  %v366_v31 = vld [vmem:[#allocation5 + $0x8] sm:$0xff] }
  0x3d   : > { %v301_v32 = vld [vmem:[%s1748_s7] sm:$0xff]  ;;  %v302_v33 = vld [vmem:[%s1748_s7 + $0x8] sm:$0xff]  ;;  %v303_v34 = vld [vmem:[%s1748_s7 + $0x10] sm:$0xff]  ;;  %p1485_p8 = pneg %p1484_p4 }
  0x3e   : > { %v304_v35 = vld [vmem:[%s1748_s7 + $0x18] sm:$0xff]  ;;  %v305_v36 = vld [vmem:[%s1748_s7 + $0x20] sm:$0xff]  ;;  %v306_v37 = vld [vmem:[%s1748_s7 + $0x28] sm:$0xff] }
  0x3f   : > { %400 = vmatpush.xpose.msra.mxu0 %v389_v6  ;;  %513 = vmatpush.xpose.msra.mxu1 %v390_v7  ;;  %v307_v38 = vld [vmem:[%s1748_s7 + $0x30] sm:$0xff]  ;;  %v308_v39 = vld [vmem:[%s1748_s7 + $0x38] sm:$0xff]  ;;  %v309_v40 = vld [vmem:[%s1748_s7 + $0x40] sm:$0xff]  ;;  %p1490_p10 = pnand %p1489_p2, %p1485_p8 }
  0x40   : > { %v310_v41 = vld [vmem:[%s1748_s7 + $0x48] sm:$0xff]  ;;  %v734_v42 = vld [vmem:[#allocation7 + $0x78] sm:$0xff]  ;;  %v733_v44 = vld [vmem:[#allocation7 + $0x70] sm:$0xff] }
  0x41   : > { %v750_v43 = vld [vmem:[#allocation7 + $0xf8] sm:$0xff]  ;;  %751 = vmatpush.xpose.msra.mxu2 %v734_v42  ;;  %v749_v45 = vld [vmem:[#allocation7 + $0xf0] sm:$0xff]  ;;  %v732_v48 = vld [vmem:[#allocation7 + $0x68] sm:$0xff] }
  0x42   : > { %864 = vmatpush.xpose.msra.mxu3 %v750_v43  ;;  %v311_v46 = vld [vmem:[%s1748_s7 + $0x50] sm:$0xff]  ;;  %v312_v47 = vld [vmem:[%s1748_s7 + $0x58] sm:$0xff]  ;;  %v748_v49 = vld [vmem:[#allocation7 + $0xe8] sm:$0xff] }
  0x43   : > { %401 = vmatpush.xpose.msra.mxu0 %v387_v8  ;;  %514 = vmatpush.xpose.msra.mxu1 %v388_v9  ;;  %v731_v50 = vld [vmem:[#allocation7 + $0x60] sm:$0xff]  ;;  %v314_v53 = vld [vmem:[%s1748_s7 + $0x68] sm:$0xff]  ;;  %v730_v54 = vld [vmem:[#allocation7 + $0x58] sm:$0xff] }
  0x44   : > { %v747_v51 = vld [vmem:[#allocation7 + $0xe0] sm:$0xff]  ;;  %v746_v55 = vld [vmem:[#allocation7 + $0xd8] sm:$0xff]  ;;  %v729_v56 = vld [vmem:[#allocation7 + $0x50] sm:$0xff] }
  0x45   : > { %752 = vmatpush.xpose.msra.mxu2 %v733_v44  ;;  %v313_v52 = vld [vmem:[%s1748_s7 + $0x60] sm:$0xff]  ;;  %v745_v57 = vld [vmem:[#allocation7 + $0xd0] sm:$0xff]  ;;  %v316_v59 = vld [vmem:[%s1748_s7 + $0x78] sm:$0xff] }
  0x46   : > { %865 = vmatpush.xpose.msra.mxu3 %v749_v45  ;;  %v315_v58 = vld [vmem:[%s1748_s7 + $0x70] sm:$0xff]  ;;  %v728_v60 = vld [vmem:[#allocation7 + $0x48] sm:$0xff]  ;;  %v727_v62 = vld [vmem:[#allocation7 + $0x40] sm:$0xff] }
  0x47   : > { %402 = vmatpush.xpose.msra.mxu0 %v385_v10  ;;  %515 = vmatpush.xpose.msra.mxu1 %v386_v11  ;;  %v744_v61 = vld [vmem:[#allocation7 + $0xc8] sm:$0xff]  ;;  %v743_v63 = vld [vmem:[#allocation7 + $0xc0] sm:$0xff]  ;;  %v726_v2 = vld [vmem:[#allocation7 + $0x38] sm:$0xff] }
  0x48   : > { %v317_v0 = vld [vmem:[%s1748_s7 + $0x80] sm:$0xff]  ;;  %v318_v1 = vld [vmem:[%s1748_s7 + $0x88] sm:$0xff]  ;;  %v742_v3 = vld [vmem:[#allocation7 + $0xb8] sm:$0xff] }
  0x49   : > { %753 = vmatpush.xpose.msra.mxu2 %v732_v48  ;;  %v725_v4 = vld [vmem:[#allocation7 + $0x30] sm:$0xff]  ;;  %v320_v7 = vld [vmem:[%s1748_s7 + $0x98] sm:$0xff]  ;;  %v724_v8 = vld [vmem:[#allocation7 + $0x28] sm:$0xff] }
  0x4a   : > { %866 = vmatpush.xpose.msra.mxu3 %v748_v49  ;;  %v741_v5 = vld [vmem:[#allocation7 + $0xb0] sm:$0xff]  ;;  %v740_v9 = vld [vmem:[#allocation7 + $0xa8] sm:$0xff]  ;;  %v723_v10 = vld [vmem:[#allocation7 + $0x20] sm:$0xff] }
  0x4b   : > { %403 = vmatpush.xpose.msra.mxu0 %v383_v12  ;;  %516 = vmatpush.xpose.msra.mxu1 %v384_v13  ;;  %v319_v6 = vld [vmem:[%s1748_s7 + $0x90] sm:$0xff]  ;;  %v739_v11 = vld [vmem:[#allocation7 + $0xa0] sm:$0xff]  ;;  %v322_v13 = vld [vmem:[%s1748_s7 + $0xa8] sm:$0xff] }
  0x4c   : > { %v321_v12 = vld [vmem:[%s1748_s7 + $0xa0] sm:$0xff] }
  0x4d   : > { %754 = vmatpush.xpose.msra.mxu2 %v731_v50 }
  0x4e   : > { %867 = vmatpush.xpose.msra.mxu3 %v747_v51 }
  0x4f   : > { %404 = vmatpush.xpose.msra.mxu0 %v381_v14  ;;  %517 = vmatpush.xpose.msra.mxu1 %v382_v15  ;;  %v722_v14 = vld [vmem:[#allocation7 + $0x18] sm:$0xff] }
  0x50   : > { %v738_v15 = vld [vmem:[#allocation7 + $0x98] sm:$0xff] }
  0x51   : > { %755 = vmatpush.xpose.msra.mxu2 %v730_v54 }
  0x52   : > { %868 = vmatpush.xpose.msra.mxu3 %v746_v55 }
  0x53   : > { %405 = vmatpush.xpose.msra.mxu0 %v379_v16  ;;  %518 = vmatpush.xpose.msra.mxu1 %v380_v17  ;;  %v721_v16 = vld [vmem:[#allocation7 + $0x10] sm:$0xff] }
  0x54   : > { %v737_v17 = vld [vmem:[#allocation7 + $0x90] sm:$0xff] }
  0x55   : > { %756 = vmatpush.xpose.msra.mxu2 %v729_v56 }
  0x56   : > { %869 = vmatpush.xpose.msra.mxu3 %v745_v57 }
  0x57   : > { %406 = vmatpush.xpose.msra.mxu0 %v377_v18  ;;  %519 = vmatpush.xpose.msra.mxu1 %v378_v19  ;;  %v323_v18 = vld [vmem:[%s1748_s7 + $0xb0] sm:$0xff]  ;;  %v324_v19 = vld [vmem:[%s1748_s7 + $0xb8] sm:$0xff] }
  0x59   : > { %757 = vmatpush.xpose.msra.mxu2 %v728_v60 }
  0x5a   : > { %870 = vmatpush.xpose.msra.mxu3 %v744_v61 }
  0x5b   : > { %407 = vmatpush.xpose.msra.mxu0 %v375_v20  ;;  %520 = vmatpush.xpose.msra.mxu1 %v376_v21  ;;  %v720_v20 = vld [vmem:[#allocation7 + $0x8] sm:$0xff] }
  0x5c   : > { %v736_v21 = vld [vmem:[#allocation7 + $0x88] sm:$0xff] }
  0x5d   : > { %758 = vmatpush.xpose.msra.mxu2 %v727_v62 }
  0x5e   : > { %871 = vmatpush.xpose.msra.mxu3 %v743_v63 }
  0x5f   : > { %408 = vmatpush.xpose.msra.mxu0 %v373_v22  ;;  %521 = vmatpush.xpose.msra.mxu1 %v374_v23  ;;  %v325_v22 = vld [vmem:[%s1748_s7 + $0xc0] sm:$0xff]  ;;  %v326_v23 = vld [vmem:[%s1748_s7 + $0xc8] sm:$0xff] }
  0x61   : > { %759 = vmatpush.xpose.msra.mxu2 %v726_v2 }
  0x62   : > { %872 = vmatpush.xpose.msra.mxu3 %v742_v3 }
  0x63   : > { %409 = vmatpush.xpose.msra.mxu0 %v371_v24  ;;  %522 = vmatpush.xpose.msra.mxu1 %v372_v25  ;;  %v719_v24 = vld [vmem:[#allocation7] sm:$0xff] }
  0x64   : > { %v735_v25 = vld [vmem:[#allocation7 + $0x80] sm:$0xff] }
  0x65   : > { %760 = vmatpush.xpose.msra.mxu2 %v725_v4 }
  0x66   : > { %873 = vmatpush.xpose.msra.mxu3 %v741_v5 }
  0x67   : > { %410 = vmatpush.xpose.msra.mxu0 %v369_v26  ;;  %523 = vmatpush.xpose.msra.mxu1 %v370_v27  ;;  %v327_v26 = vld [vmem:[%s1748_s7 + $0xd0] sm:$0xff]  ;;  %v328_v27 = vld [vmem:[%s1748_s7 + $0xd8] sm:$0xff] }
  0x69   : > { %761 = vmatpush.xpose.msra.mxu2 %v724_v8 }
  0x6a   : > { %874 = vmatpush.xpose.msra.mxu3 %v740_v9 }
  0x6b   : > { %411 = vmatpush.xpose.msra.mxu0 %v367_v28  ;;  %524 = vmatpush.xpose.msra.mxu1 %v368_v29  ;;  %v329_v28 = vld [vmem:[%s1748_s7 + $0xe0] sm:$0xff]  ;;  %v330_v29 = vld [vmem:[%s1748_s7 + $0xe8] sm:$0xff] }
  0x6d   : > { %762 = vmatpush.xpose.msra.mxu2 %v723_v10 }
  0x6e   : > { %875 = vmatpush.xpose.msra.mxu3 %v739_v11 }
  0x6f   : > { %412 = vmatpush.xpose.msra.mxu0 %v365_v30  ;;  %525 = vmatpush.xpose.msra.mxu1 %v366_v31  ;;  %v331_v30 = vld [vmem:[%s1748_s7 + $0xf0] sm:$0xff]  ;;  %v332_v31 = vld [vmem:[%s1748_s7 + $0xf8] sm:$0xff] }
  0x71   : > { %763 = vmatpush.xpose.msra.mxu2 %v722_v14 }
  0x72   : > { %413 = vmatmul.f32.vlgmr.msra.gmra.mxu0 %v301_v32  ;;  %526 = vmatmul.f32.vlgmr.msra.gmra.mxu1 %v302_v33 }
  0x73   : > { %876 = vmatpush.xpose.msra.mxu3 %v738_v15 }
  0x75   : > { %764 = vmatpush.xpose.msra.mxu2 %v721_v16 }
  0x77   : > { %877 = vmatpush.xpose.msra.mxu3 %v737_v17 }
  0x79   : > { %765 = vmatpush.xpose.msra.mxu2 %v720_v20 }
  0x7a   : > { %416 = vmatmul.f32.gmra.mxu0 %v303_v34  ;;  %529 = vmatmul.f32.gmra.mxu1 %v304_v35  ;;  %v333_v34 = vld [vmem:[%s1748_s7 + $0x100] sm:$0xff]  ;;  %v334_v35 = vld [vmem:[%s1748_s7 + $0x108] sm:$0xff] }
  0x7b   : > { %878 = vmatpush.xpose.msra.mxu3 %v736_v21 }
  0x7d   : > { %766 = vmatpush.xpose.msra.mxu2 %v719_v24  ;;  %v351_v24 = vld [vmem:[%s1748_s7 + $0x190] sm:$0xff] }
  0x7f   : > { %879 = vmatpush.xpose.msra.mxu3 %v735_v25  ;;  %v352_v25 = vld [vmem:[%s1748_s7 + $0x198] sm:$0xff] }
  0x82   : > { %419 = vmatmul.f32.gmra.mxu0 %v305_v36  ;;  %532 = vmatmul.f32.gmra.mxu1 %v306_v37 }
  0x8a   : > { %422 = vmatmul.f32.gmra.mxu0 %v307_v38  ;;  %535 = vmatmul.f32.gmra.mxu1 %v308_v39 }
  0x92   : > { %425 = vmatmul.f32.gmra.mxu0 %v309_v40  ;;  %538 = vmatmul.f32.gmra.mxu1 %v310_v41  ;;  %v335_v40 = vld [vmem:[%s1748_s7 + $0x110] sm:$0xff]  ;;  %v336_v41 = vld [vmem:[%s1748_s7 + $0x118] sm:$0xff] }
  0x9a   : > { %428 = vmatmul.f32.gmra.mxu0 %v311_v46  ;;  %541 = vmatmul.f32.gmra.mxu1 %v312_v47  ;;  %v337_v46 = vld [vmem:[%s1748_s7 + $0x120] sm:$0xff]  ;;  %v338_v47 = vld [vmem:[%s1748_s7 + $0x128] sm:$0xff] }
  0xa2   : > { %431 = vmatmul.f32.gmra.mxu0 %v313_v52  ;;  %544 = vmatmul.f32.gmra.mxu1 %v314_v53  ;;  %v339_v52 = vld [vmem:[%s1748_s7 + $0x130] sm:$0xff]  ;;  %v340_v53 = vld [vmem:[%s1748_s7 + $0x138] sm:$0xff] }
  0xaa   : > { %434 = vmatmul.f32.gmra.mxu0 %v315_v58  ;;  %547 = vmatmul.f32.gmra.mxu1 %v316_v59  ;;  %v341_v58 = vld [vmem:[%s1748_s7 + $0x140] sm:$0xff]  ;;  %v342_v59 = vld [vmem:[%s1748_s7 + $0x148] sm:$0xff] }
  0xb2   : > { %437 = vmatmul.f32.gmra.mxu0 %v317_v0  ;;  %550 = vmatmul.f32.gmra.mxu1 %v318_v1  ;;  %v343_v0 = vld [vmem:[%s1748_s7 + $0x150] sm:$0xff]  ;;  %v344_v1 = vld [vmem:[%s1748_s7 + $0x158] sm:$0xff] }
  0xba   : > { %440 = vmatmul.f32.gmra.mxu0 %v319_v6  ;;  %553 = vmatmul.f32.gmra.mxu1 %v320_v7  ;;  %v345_v6 = vld [vmem:[%s1748_s7 + $0x160] sm:$0xff]  ;;  %v346_v7 = vld [vmem:[%s1748_s7 + $0x168] sm:$0xff] }
  0xc2   : > { %443 = vmatmul.f32.gmra.mxu0 %v321_v12  ;;  %556 = vmatmul.f32.gmra.mxu1 %v322_v13  ;;  %v347_v12 = vld [vmem:[%s1748_s7 + $0x170] sm:$0xff]  ;;  %v348_v13 = vld [vmem:[%s1748_s7 + $0x178] sm:$0xff] }
  0xca   : > { %446 = vmatmul.f32.gmra.mxu0 %v323_v18  ;;  %559 = vmatmul.f32.gmra.mxu1 %v324_v19  ;;  %v349_v18 = vld [vmem:[%s1748_s7 + $0x180] sm:$0xff]  ;;  %v350_v19 = vld [vmem:[%s1748_s7 + $0x188] sm:$0xff] }
  0xd2   : > { %449 = vmatmul.f32.gmra.mxu0 %v325_v22  ;;  %562 = vmatmul.f32.gmra.mxu1 %v326_v23 }
  0xda   : > { %452 = vmatmul.f32.gmra.mxu0 %v327_v26  ;;  %565 = vmatmul.f32.gmra.mxu1 %v328_v27 }
  0xe2   : > { %455 = vmatmul.f32.gmra.mxu0 %v329_v28  ;;  %568 = vmatmul.f32.gmra.mxu1 %v330_v29 }
  0xea   : > { %458 = vmatmul.f32.gmra.mxu0 %v331_v30  ;;  %571 = vmatmul.f32.gmra.mxu1 %v332_v31  ;;  %v353_v30 = vld [vmem:[%s1748_s7 + $0x1a0] sm:$0xff]  ;;  %v354_v31 = vld [vmem:[%s1748_s7 + $0x1a8] sm:$0xff] }
  0xef   : > { %v414_v32 = vpop.f32.mrf.mxu0  ;;  %v527_v33 = vpop.f32.mrf.mxu1 }
  0xf0   : > { %v528_v36 = vadd.f32 %v527_v33, %v414_v32 }
  0xf2   : > { %623 = vst [vmem:[%s1793_s29] sm:$0xff] %v528_v36  ;;  %v655_v37 = vmax.f32 %v528_v36, 0.0  ;;  %461 = vmatmul.f32.gmra.mxu0 %v333_v34  ;;  %574 = vmatmul.f32.gmra.mxu1 %v334_v35  ;;  %v355_v36 = vld [vmem:[%s1748_s7 + $0x1b0] sm:$0xff] }
  0xf4   : > { %687 = vst [vmem:[%s1796_s11] sm:$0xff] %v655_v37  ;;  %767 = vmatmul.f32.vlgmr.msra.gmra.mxu2 %v655_v37  ;;  %880 = vmatmul.f32.vlgmr.msra.gmra.mxu3 %v655_v37  ;;  %v356_v37 = vld [vmem:[%s1748_s7 + $0x1b8] sm:$0xff] }
  0xf7   : > { %v417_v38 = vpop.f32.mrf.mxu0  ;;  %v530_v39 = vpop.f32.mrf.mxu1 }
  0xf8   : > { %v531_v42 = vadd.f32 %v530_v39, %v417_v38 }
  0xfa   : > { %624 = vst [vmem:[%s1793_s29 + $0x8] sm:$0xff] %v531_v42  ;;  %v656_v43 = vmax.f32 %v531_v42, 0.0  ;;  %464 = vmatmul.f32.gmra.mxu0 %v335_v40  ;;  %577 = vmatmul.f32.gmra.mxu1 %v336_v41  ;;  %v357_v42 = vld [vmem:[%s1748_s7 + $0x1c0] sm:$0xff] }
  0xfc   : > { %688 = vst [vmem:[%s1796_s11 + $0x8] sm:$0xff] %v656_v43  ;;  %770 = vmatmul.f32.gmra.mxu2 %v656_v43  ;;  %883 = vmatmul.f32.gmra.mxu3 %v656_v43  ;;  %v358_v43 = vld [vmem:[%s1748_s7 + $0x1c8] sm:$0xff] }
  0xff   : > { %v420_v44 = vpop.f32.mrf.mxu0  ;;  %v533_v45 = vpop.f32.mrf.mxu1 }
 0x100   : > { %v534_v48 = vadd.f32 %v533_v45, %v420_v44 }
 0x102   : > { %625 = vst [vmem:[%s1793_s29 + $0x10] sm:$0xff] %v534_v48  ;;  %v657_v49 = vmax.f32 %v534_v48, 0.0  ;;  %467 = vmatmul.f32.gmra.mxu0 %v337_v46  ;;  %580 = vmatmul.f32.gmra.mxu1 %v338_v47  ;;  %v359_v48 = vld [vmem:[%s1748_s7 + $0x1d0] sm:$0xff] }
 0x104   : > { %689 = vst [vmem:[%s1796_s11 + $0x10] sm:$0xff] %v657_v49  ;;  %773 = vmatmul.f32.gmra.mxu2 %v657_v49  ;;  %886 = vmatmul.f32.gmra.mxu3 %v657_v49  ;;  %v360_v49 = vld [vmem:[%s1748_s7 + $0x1d8] sm:$0xff] }
 0x107   : > { %v423_v50 = vpop.f32.mrf.mxu0  ;;  %v536_v51 = vpop.f32.mrf.mxu1 }
 0x108   : > { %v537_v54 = vadd.f32 %v536_v51, %v423_v50 }
 0x10a   : > { %626 = vst [vmem:[%s1793_s29 + $0x18] sm:$0xff] %v537_v54  ;;  %v658_v55 = vmax.f32 %v537_v54, 0.0  ;;  %470 = vmatmul.f32.gmra.mxu0 %v339_v52  ;;  %583 = vmatmul.f32.gmra.mxu1 %v340_v53  ;;  %v361_v54 = vld [vmem:[%s1748_s7 + $0x1e0] sm:$0xff] }
 0x10c   : > { %690 = vst [vmem:[%s1796_s11 + $0x18] sm:$0xff] %v658_v55  ;;  %776 = vmatmul.f32.gmra.mxu2 %v658_v55  ;;  %889 = vmatmul.f32.gmra.mxu3 %v658_v55  ;;  %v362_v55 = vld [vmem:[%s1748_s7 + $0x1e8] sm:$0xff] }
 0x10f   : > { %v426_v56 = vpop.f32.mrf.mxu0  ;;  %v539_v57 = vpop.f32.mrf.mxu1 }
 0x110   : > { %v540_v60 = vadd.f32 %v539_v57, %v426_v56 }
 0x112   : > { %627 = vst [vmem:[%s1793_s29 + $0x20] sm:$0xff] %v540_v60  ;;  %v659_v61 = vmax.f32 %v540_v60, 0.0  ;;  %473 = vmatmul.f32.gmra.mxu0 %v341_v58  ;;  %586 = vmatmul.f32.gmra.mxu1 %v342_v59  ;;  %v363_v60 = vld [vmem:[%s1748_s7 + $0x1f0] sm:$0xff] }
 0x114   : > { %691 = vst [vmem:[%s1796_s11 + $0x20] sm:$0xff] %v659_v61  ;;  %779 = vmatmul.f32.gmra.mxu2 %v659_v61  ;;  %892 = vmatmul.f32.gmra.mxu3 %v659_v61  ;;  %v364_v61 = vld [vmem:[%s1748_s7 + $0x1f8] sm:$0xff] }
 0x117   : > { %v429_v62 = vpop.f32.mrf.mxu0  ;;  %v542_v63 = vpop.f32.mrf.mxu1 }
 0x118   : > { %v543_v2 = vadd.f32 %v542_v63, %v429_v62 }
 0x11a   : > { %628 = vst [vmem:[%s1793_s29 + $0x28] sm:$0xff] %v543_v2  ;;  %v660_v3 = vmax.f32 %v543_v2, 0.0  ;;  %476 = vmatmul.f32.gmra.mxu0 %v343_v0  ;;  %589 = vmatmul.f32.gmra.mxu1 %v344_v1 }
 0x11c   : > { %692 = vst [vmem:[%s1796_s11 + $0x28] sm:$0xff] %v660_v3  ;;  %782 = vmatmul.f32.gmra.mxu2 %v660_v3  ;;  %895 = vmatmul.f32.gmra.mxu3 %v660_v3 }
 0x11f   : > { %v432_v4 = vpop.f32.mrf.mxu0  ;;  %v545_v5 = vpop.f32.mrf.mxu1 }
 0x120   : > { %v546_v8 = vadd.f32 %v545_v5, %v432_v4 }
 0x122   : > { %629 = vst [vmem:[%s1793_s29 + $0x30] sm:$0xff] %v546_v8  ;;  %v661_v9 = vmax.f32 %v546_v8, 0.0  ;;  %479 = vmatmul.f32.gmra.mxu0 %v345_v6  ;;  %592 = vmatmul.f32.gmra.mxu1 %v346_v7 }
 0x124   : > { %693 = vst [vmem:[%s1796_s11 + $0x30] sm:$0xff] %v661_v9  ;;  %785 = vmatmul.f32.gmra.mxu2 %v661_v9  ;;  %898 = vmatmul.f32.gmra.mxu3 %v661_v9 }
 0x127   : > { %v435_v10 = vpop.f32.mrf.mxu0  ;;  %v548_v11 = vpop.f32.mrf.mxu1 }
 0x128   : > { %v549_v14 = vadd.f32 %v548_v11, %v435_v10 }
 0x12a   : > { %630 = vst [vmem:[%s1793_s29 + $0x38] sm:$0xff] %v549_v14  ;;  %v662_v15 = vmax.f32 %v549_v14, 0.0  ;;  %482 = vmatmul.f32.gmra.mxu0 %v347_v12  ;;  %595 = vmatmul.f32.gmra.mxu1 %v348_v13 }
 0x12c   : > { %694 = vst [vmem:[%s1796_s11 + $0x38] sm:$0xff] %v662_v15  ;;  %788 = vmatmul.f32.gmra.mxu2 %v662_v15  ;;  %901 = vmatmul.f32.gmra.mxu3 %v662_v15 }
 0x12f   : > { %v438_v16 = vpop.f32.mrf.mxu0  ;;  %v551_v17 = vpop.f32.mrf.mxu1 }
 0x130   : > { %v552_v20 = vadd.f32 %v551_v17, %v438_v16 }
 0x132   : > { %631 = vst [vmem:[%s1793_s29 + $0x40] sm:$0xff] %v552_v20  ;;  %v663_v21 = vmax.f32 %v552_v20, 0.0  ;;  %485 = vmatmul.f32.gmra.mxu0 %v349_v18  ;;  %598 = vmatmul.f32.gmra.mxu1 %v350_v19 }
 0x134   : > { %695 = vst [vmem:[%s1796_s11 + $0x40] sm:$0xff] %v663_v21  ;;  %791 = vmatmul.f32.gmra.mxu2 %v663_v21  ;;  %904 = vmatmul.f32.gmra.mxu3 %v663_v21 }
 0x137   : > { %v441_v22 = vpop.f32.mrf.mxu0  ;;  %v554_v23 = vpop.f32.mrf.mxu1 }
 0x138   : > { %v555_v26 = vadd.f32 %v554_v23, %v441_v22 }
 0x13a   : > { %632 = vst [vmem:[%s1793_s29 + $0x48] sm:$0xff] %v555_v26  ;;  %v664_v27 = vmax.f32 %v555_v26, 0.0  ;;  %488 = vmatmul.f32.gmra.mxu0 %v351_v24  ;;  %601 = vmatmul.f32.gmra.mxu1 %v352_v25 }
 0x13c   : > { %696 = vst [vmem:[%s1796_s11 + $0x48] sm:$0xff] %v664_v27  ;;  %794 = vmatmul.f32.gmra.mxu2 %v664_v27  ;;  %907 = vmatmul.f32.gmra.mxu3 %v664_v27 }
 0x13f   : > { %v444_v28 = vpop.f32.mrf.mxu0  ;;  %v557_v29 = vpop.f32.mrf.mxu1 }
 0x140   : > { %v558_v32 = vadd.f32 %v557_v29, %v444_v28 }
 0x142   : > { %633 = vst [vmem:[%s1793_s29 + $0x50] sm:$0xff] %v558_v32  ;;  %v665_v33 = vmax.f32 %v558_v32, 0.0  ;;  %491 = vmatmul.f32.gmra.mxu0 %v353_v30  ;;  %604 = vmatmul.f32.gmra.mxu1 %v354_v31 }
 0x144   : > { %697 = vst [vmem:[%s1796_s11 + $0x50] sm:$0xff] %v665_v33  ;;  %797 = vmatmul.f32.gmra.mxu2 %v665_v33  ;;  %910 = vmatmul.f32.gmra.mxu3 %v665_v33 }
 0x147   : > { %v447_v34 = vpop.f32.mrf.mxu0  ;;  %v560_v35 = vpop.f32.mrf.mxu1 }
 0x148   : > { %v561_v38 = vadd.f32 %v560_v35, %v447_v34 }
 0x14a   : > { %634 = vst [vmem:[%s1793_s29 + $0x58] sm:$0xff] %v561_v38  ;;  %v666_v39 = vmax.f32 %v561_v38, 0.0  ;;  %494 = vmatmul.f32.gmra.mxu0 %v355_v36  ;;  %607 = vmatmul.f32.gmra.mxu1 %v356_v37 }
 0x14c   : > { %698 = vst [vmem:[%s1796_s11 + $0x58] sm:$0xff] %v666_v39  ;;  %800 = vmatmul.f32.gmra.mxu2 %v666_v39  ;;  %913 = vmatmul.f32.gmra.mxu3 %v666_v39 }
 0x14f   : > { %v450_v40 = vpop.f32.mrf.mxu0  ;;  %v563_v41 = vpop.f32.mrf.mxu1 }
 0x150   : > { %v564_v44 = vadd.f32 %v563_v41, %v450_v40 }
 0x152   : > { %635 = vst [vmem:[%s1793_s29 + $0x60] sm:$0xff] %v564_v44  ;;  %v667_v45 = vmax.f32 %v564_v44, 0.0  ;;  %497 = vmatmul.f32.gmra.mxu0 %v357_v42  ;;  %610 = vmatmul.f32.gmra.mxu1 %v358_v43 }
 0x154   : > { %699 = vst [vmem:[%s1796_s11 + $0x60] sm:$0xff] %v667_v45  ;;  %803 = vmatmul.f32.gmra.mxu2 %v667_v45  ;;  %916 = vmatmul.f32.gmra.mxu3 %v667_v45 }
 0x157   : > { %v453_v46 = vpop.f32.mrf.mxu0  ;;  %v566_v47 = vpop.f32.mrf.mxu1 }
 0x158   : > { %v567_v50 = vadd.f32 %v566_v47, %v453_v46 }
 0x15a   : > { %636 = vst [vmem:[%s1793_s29 + $0x68] sm:$0xff] %v567_v50  ;;  %v668_v51 = vmax.f32 %v567_v50, 0.0  ;;  %500 = vmatmul.f32.gmra.mxu0 %v359_v48  ;;  %613 = vmatmul.f32.gmra.mxu1 %v360_v49 }
 0x15c   : > { %700 = vst [vmem:[%s1796_s11 + $0x68] sm:$0xff] %v668_v51  ;;  %806 = vmatmul.f32.gmra.mxu2 %v668_v51  ;;  %919 = vmatmul.f32.gmra.mxu3 %v668_v51 }
 0x15f   : > { %v456_v52 = vpop.f32.mrf.mxu0  ;;  %v569_v53 = vpop.f32.mrf.mxu1 }
 0x160   : > { %v570_v56 = vadd.f32 %v569_v53, %v456_v52 }
 0x162   : > { %637 = vst [vmem:[%s1793_s29 + $0x70] sm:$0xff] %v570_v56  ;;  %v669_v57 = vmax.f32 %v570_v56, 0.0  ;;  %503 = vmatmul.f32.gmra.mxu0 %v361_v54  ;;  %616 = vmatmul.f32.gmra.mxu1 %v362_v55 }
 0x164   : > { %701 = vst [vmem:[%s1796_s11 + $0x70] sm:$0xff] %v669_v57  ;;  %809 = vmatmul.f32.gmra.mxu2 %v669_v57  ;;  %922 = vmatmul.f32.gmra.mxu3 %v669_v57 }
 0x167   : > { %v459_v58 = vpop.f32.mrf.mxu0  ;;  %v572_v59 = vpop.f32.mrf.mxu1 }
 0x168   : > { %v573_v62 = vadd.f32 %v572_v59, %v459_v58 }
 0x16a   : > { %638 = vst [vmem:[%s1793_s29 + $0x78] sm:$0xff] %v573_v62  ;;  %v670_v63 = vmax.f32 %v573_v62, 0.0  ;;  %506 = vmatmul.f32.gmra.mxu0 %v363_v60  ;;  %619 = vmatmul.f32.gmra.mxu1 %v364_v61 }
 0x16c   : > { %702 = vst [vmem:[%s1796_s11 + $0x78] sm:$0xff] %v670_v63  ;;  %812 = vmatmul.f32.gmra.mxu2 %v670_v63  ;;  %925 = vmatmul.f32.gmra.mxu3 %v670_v63 }
 0x16f   : > { %v462_v0 = vpop.f32.mrf.mxu0  ;;  %v575_v1 = vpop.f32.mrf.mxu1 }
 0x170   : > { %v576_v2 = vadd.f32 %v575_v1, %v462_v0 }
 0x172   : > { %639 = vst [vmem:[%s1793_s29 + $0x80] sm:$0xff] %v576_v2  ;;  %v671_v3 = vmax.f32 %v576_v2, 0.0 }
 0x174   : > { %703 = vst [vmem:[%s1796_s11 + $0x80] sm:$0xff] %v671_v3  ;;  %815 = vmatmul.f32.gmra.mxu2 %v671_v3  ;;  %928 = vmatmul.f32.gmra.mxu3 %v671_v3 }
 0x177   : > { %v465_v4 = vpop.f32.mrf.mxu0  ;;  %v578_v5 = vpop.f32.mrf.mxu1 }
 0x178   : > { %v579_v6 = vadd.f32 %v578_v5, %v465_v4  ;;  %v768_v7 = vpop.f32.mrf.mxu2  ;;  %v881_v8 = vpop.f32.mrf.mxu3 }
 0x179   : > { %977 = vst [vmem:[%s1863_s14] sm:$0xff] %v768_v7 }
 0x17a   : > { %640 = vst [vmem:[%s1793_s29 + $0x88] sm:$0xff] %v579_v6  ;;  %v672_v9 = vmax.f32 %v579_v6, 0.0 }
 0x17b   : > { %978 = vst [vmem:[%s1863_s14 + $0x8] sm:$0xff] %v881_v8 }
 0x17c   : > { %704 = vst [vmem:[%s1796_s11 + $0x88] sm:$0xff] %v672_v9  ;;  %818 = vmatmul.f32.gmra.mxu2 %v672_v9  ;;  %931 = vmatmul.f32.gmra.mxu3 %v672_v9 }
 0x17f   : > { %v468_v10 = vpop.f32.mrf.mxu0  ;;  %v581_v11 = vpop.f32.mrf.mxu1 }
 0x180   : > { %v582_v12 = vadd.f32 %v581_v11, %v468_v10  ;;  %v771_v13 = vpop.f32.mrf.mxu2  ;;  %v884_v14 = vpop.f32.mrf.mxu3 }
 0x181   : > { %979 = vst [vmem:[%s1863_s14 + $0x10] sm:$0xff] %v771_v13 }
 0x182   : > { %641 = vst [vmem:[%s1793_s29 + $0x90] sm:$0xff] %v582_v12  ;;  %v673_v15 = vmax.f32 %v582_v12, 0.0 }
 0x183   : > { %980 = vst [vmem:[%s1863_s14 + $0x18] sm:$0xff] %v884_v14 }
 0x184   : > { %705 = vst [vmem:[%s1796_s11 + $0x90] sm:$0xff] %v673_v15  ;;  %821 = vmatmul.f32.gmra.mxu2 %v673_v15  ;;  %934 = vmatmul.f32.gmra.mxu3 %v673_v15 }
 0x187   : > { %v471_v16 = vpop.f32.mrf.mxu0  ;;  %v584_v17 = vpop.f32.mrf.mxu1 }
 0x188   : > { %v585_v18 = vadd.f32 %v584_v17, %v471_v16  ;;  %v774_v19 = vpop.f32.mrf.mxu2  ;;  %v887_v20 = vpop.f32.mrf.mxu3 }
 0x189   : > { %981 = vst [vmem:[%s1863_s14 + $0x20] sm:$0xff] %v774_v19 }
 0x18a   : > { %642 = vst [vmem:[%s1793_s29 + $0x98] sm:$0xff] %v585_v18  ;;  %v674_v21 = vmax.f32 %v585_v18, 0.0 }
 0x18b   : > { %982 = vst [vmem:[%s1863_s14 + $0x28] sm:$0xff] %v887_v20 }
 0x18c   : > { %706 = vst [vmem:[%s1796_s11 + $0x98] sm:$0xff] %v674_v21  ;;  %824 = vmatmul.f32.gmra.mxu2 %v674_v21  ;;  %937 = vmatmul.f32.gmra.mxu3 %v674_v21 }
 0x18f   : > { %v474_v22 = vpop.f32.mrf.mxu0  ;;  %v587_v23 = vpop.f32.mrf.mxu1 }
 0x190   : > { %v588_v24 = vadd.f32 %v587_v23, %v474_v22  ;;  %v777_v25 = vpop.f32.mrf.mxu2  ;;  %v890_v26 = vpop.f32.mrf.mxu3 }
 0x191   : > { %983 = vst [vmem:[%s1863_s14 + $0x30] sm:$0xff] %v777_v25 }
 0x192   : > { %643 = vst [vmem:[%s1793_s29 + $0xa0] sm:$0xff] %v588_v24  ;;  %v675_v27 = vmax.f32 %v588_v24, 0.0 }
 0x193   : > { %984 = vst [vmem:[%s1863_s14 + $0x38] sm:$0xff] %v890_v26 }
 0x194   : > { %707 = vst [vmem:[%s1796_s11 + $0xa0] sm:$0xff] %v675_v27  ;;  %827 = vmatmul.f32.gmra.mxu2 %v675_v27  ;;  %940 = vmatmul.f32.gmra.mxu3 %v675_v27 }
 0x197   : > { %v477_v28 = vpop.f32.mrf.mxu0  ;;  %v590_v29 = vpop.f32.mrf.mxu1 }
 0x198   : > { %v591_v30 = vadd.f32 %v590_v29, %v477_v28  ;;  %v780_v31 = vpop.f32.mrf.mxu2  ;;  %v893_v32 = vpop.f32.mrf.mxu3 }
 0x199   : > { %985 = vst [vmem:[%s1863_s14 + $0x40] sm:$0xff] %v780_v31 }
 0x19a   : > { %644 = vst [vmem:[%s1793_s29 + $0xa8] sm:$0xff] %v591_v30  ;;  %v676_v33 = vmax.f32 %v591_v30, 0.0 }
 0x19b   : > { %986 = vst [vmem:[%s1863_s14 + $0x48] sm:$0xff] %v893_v32 }
 0x19c   : > { %708 = vst [vmem:[%s1796_s11 + $0xa8] sm:$0xff] %v676_v33  ;;  %830 = vmatmul.f32.gmra.mxu2 %v676_v33  ;;  %943 = vmatmul.f32.gmra.mxu3 %v676_v33 }
 0x19f   : > { %v480_v34 = vpop.f32.mrf.mxu0  ;;  %v593_v35 = vpop.f32.mrf.mxu1 }
 0x1a0   : > { %v594_v36 = vadd.f32 %v593_v35, %v480_v34  ;;  %v783_v37 = vpop.f32.mrf.mxu2  ;;  %v896_v38 = vpop.f32.mrf.mxu3 }
 0x1a1   : > { %987 = vst [vmem:[%s1863_s14 + $0x50] sm:$0xff] %v783_v37 }
 0x1a2   : > { %645 = vst [vmem:[%s1793_s29 + $0xb0] sm:$0xff] %v594_v36  ;;  %v677_v39 = vmax.f32 %v594_v36, 0.0 }
 0x1a3   : > { %988 = vst [vmem:[%s1863_s14 + $0x58] sm:$0xff] %v896_v38 }
 0x1a4   : > { %709 = vst [vmem:[%s1796_s11 + $0xb0] sm:$0xff] %v677_v39  ;;  %833 = vmatmul.f32.gmra.mxu2 %v677_v39  ;;  %946 = vmatmul.f32.gmra.mxu3 %v677_v39 }
 0x1a7   : > { %v483_v40 = vpop.f32.mrf.mxu0  ;;  %v596_v41 = vpop.f32.mrf.mxu1 }
 0x1a8   : > { %v597_v42 = vadd.f32 %v596_v41, %v483_v40  ;;  %v786_v43 = vpop.f32.mrf.mxu2  ;;  %v899_v44 = vpop.f32.mrf.mxu3 }
 0x1a9   : > { %989 = vst [vmem:[%s1863_s14 + $0x60] sm:$0xff] %v786_v43 }
 0x1aa   : > { %646 = vst [vmem:[%s1793_s29 + $0xb8] sm:$0xff] %v597_v42  ;;  %v678_v45 = vmax.f32 %v597_v42, 0.0 }
 0x1ab   : > { %990 = vst [vmem:[%s1863_s14 + $0x68] sm:$0xff] %v899_v44 }
 0x1ac   : > { %710 = vst [vmem:[%s1796_s11 + $0xb8] sm:$0xff] %v678_v45  ;;  %836 = vmatmul.f32.gmra.mxu2 %v678_v45  ;;  %949 = vmatmul.f32.gmra.mxu3 %v678_v45 }
 0x1af   : > { %v486_v46 = vpop.f32.mrf.mxu0  ;;  %v599_v47 = vpop.f32.mrf.mxu1 }
 0x1b0   : > { %v600_v48 = vadd.f32 %v599_v47, %v486_v46  ;;  %v789_v49 = vpop.f32.mrf.mxu2  ;;  %v902_v50 = vpop.f32.mrf.mxu3 }
 0x1b1   : > { %991 = vst [vmem:[%s1863_s14 + $0x70] sm:$0xff] %v789_v49 }
 0x1b2   : > { %647 = vst [vmem:[%s1793_s29 + $0xc0] sm:$0xff] %v600_v48  ;;  %v679_v51 = vmax.f32 %v600_v48, 0.0 }
 0x1b3   : > { %992 = vst [vmem:[%s1863_s14 + $0x78] sm:$0xff] %v902_v50 }
 0x1b4   : > { %711 = vst [vmem:[%s1796_s11 + $0xc0] sm:$0xff] %v679_v51  ;;  %839 = vmatmul.f32.gmra.mxu2 %v679_v51  ;;  %952 = vmatmul.f32.gmra.mxu3 %v679_v51 }
 0x1b7   : > { %v489_v52 = vpop.f32.mrf.mxu0  ;;  %v602_v53 = vpop.f32.mrf.mxu1 }
 0x1b8   : > { %v603_v54 = vadd.f32 %v602_v53, %v489_v52  ;;  %v792_v55 = vpop.f32.mrf.mxu2  ;;  %v905_v56 = vpop.f32.mrf.mxu3 }
 0x1b9   : > { %993 = vst [vmem:[%s1863_s14 + $0x80] sm:$0xff] %v792_v55 }
 0x1ba   : > { %648 = vst [vmem:[%s1793_s29 + $0xc8] sm:$0xff] %v603_v54  ;;  %v680_v57 = vmax.f32 %v603_v54, 0.0 }
 0x1bb   : > { %994 = vst [vmem:[%s1863_s14 + $0x88] sm:$0xff] %v905_v56 }
 0x1bc   : > { %712 = vst [vmem:[%s1796_s11 + $0xc8] sm:$0xff] %v680_v57  ;;  %842 = vmatmul.f32.gmra.mxu2 %v680_v57  ;;  %955 = vmatmul.f32.gmra.mxu3 %v680_v57 }
 0x1bf   : > { %v492_v58 = vpop.f32.mrf.mxu0  ;;  %v605_v59 = vpop.f32.mrf.mxu1 }
 0x1c0   : > { %v606_v60 = vadd.f32 %v605_v59, %v492_v58  ;;  %v795_v61 = vpop.f32.mrf.mxu2  ;;  %v908_v62 = vpop.f32.mrf.mxu3 }
 0x1c1   : > { %995 = vst [vmem:[%s1863_s14 + $0x90] sm:$0xff] %v795_v61 }
 0x1c2   : > { %649 = vst [vmem:[%s1793_s29 + $0xd0] sm:$0xff] %v606_v60  ;;  %v681_v63 = vmax.f32 %v606_v60, 0.0 }
 0x1c3   : > { %996 = vst [vmem:[%s1863_s14 + $0x98] sm:$0xff] %v908_v62 }
 0x1c4   : > { %713 = vst [vmem:[%s1796_s11 + $0xd0] sm:$0xff] %v681_v63  ;;  %845 = vmatmul.f32.gmra.mxu2 %v681_v63  ;;  %958 = vmatmul.f32.gmra.mxu3 %v681_v63 }
 0x1c7   : > { %v495_v0 = vpop.f32.mrf.mxu0  ;;  %v608_v1 = vpop.f32.mrf.mxu1 }
 0x1c8   : > { %v609_v2 = vadd.f32 %v608_v1, %v495_v0  ;;  %v798_v3 = vpop.f32.mrf.mxu2  ;;  %v911_v4 = vpop.f32.mrf.mxu3 }
 0x1c9   : > { %997 = vst [vmem:[%s1863_s14 + $0xa0] sm:$0xff] %v798_v3 }
 0x1ca   : > { %650 = vst [vmem:[%s1793_s29 + $0xd8] sm:$0xff] %v609_v2  ;;  %v682_v5 = vmax.f32 %v609_v2, 0.0 }
 0x1cb   : > { %998 = vst [vmem:[%s1863_s14 + $0xa8] sm:$0xff] %v911_v4 }
 0x1cc   : > { %714 = vst [vmem:[%s1796_s11 + $0xd8] sm:$0xff] %v682_v5  ;;  %848 = vmatmul.f32.gmra.mxu2 %v682_v5  ;;  %961 = vmatmul.f32.gmra.mxu3 %v682_v5 }
 0x1cf   : > { %v498_v6 = vpop.f32.mrf.mxu0  ;;  %v611_v7 = vpop.f32.mrf.mxu1 }
 0x1d0   : > { %v612_v8 = vadd.f32 %v611_v7, %v498_v6  ;;  %v801_v9 = vpop.f32.mrf.mxu2  ;;  %v914_v10 = vpop.f32.mrf.mxu3 }
 0x1d1   : > { %999 = vst [vmem:[%s1863_s14 + $0xb0] sm:$0xff] %v801_v9 }
 0x1d2   : > { %651 = vst [vmem:[%s1793_s29 + $0xe0] sm:$0xff] %v612_v8  ;;  %v683_v11 = vmax.f32 %v612_v8, 0.0 }
 0x1d3   : > { %1000 = vst [vmem:[%s1863_s14 + $0xb8] sm:$0xff] %v914_v10 }
 0x1d4   : > { %715 = vst [vmem:[%s1796_s11 + $0xe0] sm:$0xff] %v683_v11  ;;  %851 = vmatmul.f32.gmra.mxu2 %v683_v11  ;;  %964 = vmatmul.f32.gmra.mxu3 %v683_v11 }
 0x1d7   : > { %v501_v12 = vpop.f32.mrf.mxu0  ;;  %v614_v13 = vpop.f32.mrf.mxu1 }
 0x1d8   : > { %v615_v14 = vadd.f32 %v614_v13, %v501_v12  ;;  %v804_v15 = vpop.f32.mrf.mxu2  ;;  %v917_v16 = vpop.f32.mrf.mxu3 }
 0x1d9   : > { %1001 = vst [vmem:[%s1863_s14 + $0xc0] sm:$0xff] %v804_v15 }
 0x1da   : > { %652 = vst [vmem:[%s1793_s29 + $0xe8] sm:$0xff] %v615_v14  ;;  %v684_v17 = vmax.f32 %v615_v14, 0.0 }
 0x1db   : > { %1002 = vst [vmem:[%s1863_s14 + $0xc8] sm:$0xff] %v917_v16 }
 0x1dc   : > { %716 = vst [vmem:[%s1796_s11 + $0xe8] sm:$0xff] %v684_v17  ;;  %854 = vmatmul.f32.gmra.mxu2 %v684_v17  ;;  %967 = vmatmul.f32.gmra.mxu3 %v684_v17 }
 0x1df   : > { %v504_v18 = vpop.f32.mrf.mxu0  ;;  %v617_v19 = vpop.f32.mrf.mxu1 }
 0x1e0   : > { %v618_v20 = vadd.f32 %v617_v19, %v504_v18  ;;  %v807_v21 = vpop.f32.mrf.mxu2  ;;  %v920_v22 = vpop.f32.mrf.mxu3 }
 0x1e1   : > { %1003 = vst [vmem:[%s1863_s14 + $0xd0] sm:$0xff] %v807_v21 }
 0x1e2   : > { %653 = vst [vmem:[%s1793_s29 + $0xf0] sm:$0xff] %v618_v20  ;;  %v685_v23 = vmax.f32 %v618_v20, 0.0 }
 0x1e3   : > { %1004 = vst [vmem:[%s1863_s14 + $0xd8] sm:$0xff] %v920_v22 }
 0x1e4   : > { %717 = vst [vmem:[%s1796_s11 + $0xf0] sm:$0xff] %v685_v23  ;;  %857 = vmatmul.f32.gmra.mxu2 %v685_v23  ;;  %970 = vmatmul.f32.gmra.mxu3 %v685_v23 }
 0x1e7   : > { %v507_v24 = vpop.f32.mrf.mxu0  ;;  %v620_v25 = vpop.f32.mrf.mxu1 }
 0x1e8   : > { %v621_v26 = vadd.f32 %v620_v25, %v507_v24  ;;  %v810_v27 = vpop.f32.mrf.mxu2  ;;  %v923_v28 = vpop.f32.mrf.mxu3 }
 0x1e9   : > { %1005 = vst [vmem:[%s1863_s14 + $0xe0] sm:$0xff] %v810_v27 }
 0x1ea   : > { %654 = vst [vmem:[%s1793_s29 + $0xf8] sm:$0xff] %v621_v26  ;;  %v686_v29 = vmax.f32 %v621_v26, 0.0 }
 0x1eb   : > { %1006 = vst [vmem:[%s1863_s14 + $0xe8] sm:$0xff] %v923_v28 }
 0x1ec   : > { %718 = vst [vmem:[%s1796_s11 + $0xf8] sm:$0xff] %v686_v29  ;;  %860 = vmatmul.f32.gmra.mxu2 %v686_v29  ;;  %973 = vmatmul.f32.gmra.mxu3 %v686_v29 }
 0x1f0   : > { %v813_v30 = vpop.f32.mrf.mxu2  ;;  %v926_v31 = vpop.f32.mrf.mxu3 }
 0x1f1   : > { %1007 = vst [vmem:[%s1863_s14 + $0xf0] sm:$0xff] %v813_v30 }
 0x1f2   : > { %1008 = vst [vmem:[%s1863_s14 + $0xf8] sm:$0xff] %v926_v31 }
 0x1f3   : > { %1493 = shalt.err (!%p1490_p10)
}
 0x1f4   : > { %s1604_s11 = smov 128   ;;  %s1605_s6 = smov 8  }
 0x1f5   : > { %1302 = dma.vmem_to_hbm [thread:$0]  (%p1712_p5), %s1083_s9, 4096, %s1085_s12, %s1935_s30, %s1604_s11, %s1604_s11, %s1605_s6  }
 0x1f6   : > { %s2048_s8 = sshll.u32 %s1659_s22, 8  ;;  %s1099_s10 = sshll.u32 %s1793_s29, 4  ;;  %s1100_s10 = int_to_ptr.vmem [resolvable:$true] %s1099_s10 }
 0x1f7   : > { %s1098_s15 = scalar_lea.hbm %s2038_s5, %s2048_s8  ;;  %s1514_s7 = scalar_lea.hbm %s2038_s5, 512 }
 0x1f8   : > { %s1101_s23 = sshll.u32 %s1098_s15, 4  ;;  %v816_v32 = vpop.f32.mrf.mxu2  ;;  %v929_v33 = vpop.f32.mrf.mxu3  ;;  %s1102_s23 = int_to_ptr.hbm [resolvable:$true] %s1101_s23 }
 0x1f9   : > { %1009 = vst [vmem:[%s1863_s14 + $0x100] sm:$0xff] %v816_v32  ;;  %s1508_s17 = sshra.s32 %s1102_s23, 4  ;;  %s1509_s17 = int_to_ptr.hbm [resolvable:$true] %s1508_s17 }
 0x1fa   : > { %1010 = vst [vmem:[%s1863_s14 + $0x108] sm:$0xff] %v929_v33  ;;  %s1510_s26 = scalar_lea.hbm %s1509_s17, 256  ;;  %p1515_p3 = scmp.lt.s32.totalorder %s1509_s17, %s2038_s5 }
 0x1fb   : > { %p1511_p12 = scmp.ne.s32.totalorder %s1509_s17, %s1510_s26  ;;  %p1516_p7 = scmp.lt.s32.totalorder %s1514_s7, %s1510_s26 }
 0x1fd   : > { %p1512_p13 = pnand %p1511_p12, %p1712_p5  ;;  %p1517_p1 = por %p1516_p7, %p1515_p3 }
 0x1ff   : > { %p1513_p0 = pneg %p1512_p13 }
 0x201   : > { %p1518_p4 = pnand %p1517_p1, %p1513_p0 }
 0x203   : > { %1521 = shalt.err (!%p1518_p4)
}
 0x204   : > { %1303 = dma.vmem_to_hbm [thread:$0]  (%p1712_p5), %s1100_s10, 4096, %s1102_s23, %s1935_s30, %s1604_s11, %s1604_s11, %s1605_s6   ;;  %v819_v34 = vpop.f32.mrf.mxu2  ;;  %v932_v35 = vpop.f32.mrf.mxu3 }
 0x205   : > { %1011 = vst [vmem:[%s1863_s14 + $0x110] sm:$0xff] %v819_v34  ;;  %s1288_s29 = sshll.u32 %s1659_s22, 9  ;;  %s1065_s15 = sshll.u32 %s1863_s14, 4  ;;  %s1066_s15 = int_to_ptr.vmem [resolvable:$true] %s1065_s15 }
 0x206   : > { %1012 = vst [vmem:[%s1863_s14 + $0x118] sm:$0xff] %v932_v35  ;;  %s1064_s6 = scalar_lea.hbm %s2036_s3, %s1288_s29  ;;  %s1042_s10 = scalar_lea.sflag [#allocation4], %s1742_s13 }
 0x207   : > { %s1067_s23 = sshll.u32 %s1064_s6, 4  ;;  %s1542_s12 = scalar_lea.hbm %s2036_s3, 1024  ;;  %s1068_s23 = int_to_ptr.hbm [resolvable:$true] %s1067_s23 }
 0x208   : > { %s1536_s17 = sshra.s32 %s1068_s23, 4  ;;  %s1537_s17 = int_to_ptr.hbm [resolvable:$true] %s1536_s17 }
 0x209   : > { %s1538_s22 = scalar_lea.hbm %s1537_s17, 512  ;;  %p1543_p2 = scmp.lt.s32.totalorder %s1537_s17, %s2036_s3 }
 0x20a   : > { %p1539_p8 = scmp.ne.s32.totalorder %s1537_s17, %s1538_s22  ;;  %p1544_p10 = scmp.lt.s32.totalorder %s1542_s12, %s1538_s22 }
 0x20c   : > { %v822_v36 = vpop.f32.mrf.mxu2  ;;  %v935_v37 = vpop.f32.mrf.mxu3  ;;  %p1540_p11 = pnand %p1539_p8, %p1712_p5  ;;  %p1545_p12 = por %p1544_p10, %p1543_p2 }
 0x20d   : > { %1013 = vst [vmem:[%s1863_s14 + $0x120] sm:$0xff] %v822_v36 }
 0x20e   : > { %1014 = vst [vmem:[%s1863_s14 + $0x128] sm:$0xff] %v935_v37  ;;  %p1541_p9 = pneg %p1540_p11 }
 0x210   : > { %p1546_p13 = pnand %p1545_p12, %p1541_p9 }
 0x214   : > { %v825_v38 = vpop.f32.mrf.mxu2  ;;  %v938_v39 = vpop.f32.mrf.mxu3 }
 0x215   : > { %1015 = vst [vmem:[%s1863_s14 + $0x130] sm:$0xff] %v825_v38 }
 0x216   : > { %1016 = vst [vmem:[%s1863_s14 + $0x138] sm:$0xff] %v938_v39 }
 0x21c   : > { %v828_v40 = vpop.f32.mrf.mxu2  ;;  %v941_v41 = vpop.f32.mrf.mxu3 }
 0x21d   : > { %1017 = vst [vmem:[%s1863_s14 + $0x140] sm:$0xff] %v828_v40 }
 0x21e   : > { %1018 = vst [vmem:[%s1863_s14 + $0x148] sm:$0xff] %v941_v41 }
 0x224   : > { %v831_v42 = vpop.f32.mrf.mxu2  ;;  %v944_v43 = vpop.f32.mrf.mxu3 }
 0x225   : > { %1019 = vst [vmem:[%s1863_s14 + $0x150] sm:$0xff] %v831_v42 }
 0x226   : > { %1020 = vst [vmem:[%s1863_s14 + $0x158] sm:$0xff] %v944_v43 }
 0x22c   : > { %v834_v44 = vpop.f32.mrf.mxu2  ;;  %v947_v45 = vpop.f32.mrf.mxu3 }
 0x22d   : > { %1021 = vst [vmem:[%s1863_s14 + $0x160] sm:$0xff] %v834_v44 }
 0x22e   : > { %1022 = vst [vmem:[%s1863_s14 + $0x168] sm:$0xff] %v947_v45 }
 0x234   : > { %v837_v46 = vpop.f32.mrf.mxu2  ;;  %v950_v47 = vpop.f32.mrf.mxu3 }
 0x235   : > { %1023 = vst [vmem:[%s1863_s14 + $0x170] sm:$0xff] %v837_v46 }
 0x236   : > { %1024 = vst [vmem:[%s1863_s14 + $0x178] sm:$0xff] %v950_v47 }
 0x23c   : > { %v840_v48 = vpop.f32.mrf.mxu2  ;;  %v953_v49 = vpop.f32.mrf.mxu3 }
 0x23d   : > { %1025 = vst [vmem:[%s1863_s14 + $0x180] sm:$0xff] %v840_v48 }
 0x23e   : > { %1026 = vst [vmem:[%s1863_s14 + $0x188] sm:$0xff] %v953_v49 }
 0x244   : > { %v843_v50 = vpop.f32.mrf.mxu2  ;;  %v956_v51 = vpop.f32.mrf.mxu3 }
 0x245   : > { %1027 = vst [vmem:[%s1863_s14 + $0x190] sm:$0xff] %v843_v50 }
 0x246   : > { %1028 = vst [vmem:[%s1863_s14 + $0x198] sm:$0xff] %v956_v51 }
 0x24c   : > { %v846_v52 = vpop.f32.mrf.mxu2  ;;  %v959_v53 = vpop.f32.mrf.mxu3 }
 0x24d   : > { %1029 = vst [vmem:[%s1863_s14 + $0x1a0] sm:$0xff] %v846_v52 }
 0x24e   : > { %1030 = vst [vmem:[%s1863_s14 + $0x1a8] sm:$0xff] %v959_v53 }
 0x254   : > { %v849_v54 = vpop.f32.mrf.mxu2  ;;  %v962_v55 = vpop.f32.mrf.mxu3 }
 0x255   : > { %1031 = vst [vmem:[%s1863_s14 + $0x1b0] sm:$0xff] %v849_v54 }
 0x256   : > { %1032 = vst [vmem:[%s1863_s14 + $0x1b8] sm:$0xff] %v962_v55 }
 0x25c   : > { %v852_v56 = vpop.f32.mrf.mxu2  ;;  %v965_v57 = vpop.f32.mrf.mxu3 }
 0x25d   : > { %1033 = vst [vmem:[%s1863_s14 + $0x1c0] sm:$0xff] %v852_v56 }
 0x25e   : > { %1034 = vst [vmem:[%s1863_s14 + $0x1c8] sm:$0xff] %v965_v57 }
 0x264   : > { %v855_v58 = vpop.f32.mrf.mxu2  ;;  %v968_v59 = vpop.f32.mrf.mxu3 }
 0x265   : > { %1035 = vst [vmem:[%s1863_s14 + $0x1d0] sm:$0xff] %v855_v58 }
 0x266   : > { %1036 = vst [vmem:[%s1863_s14 + $0x1d8] sm:$0xff] %v968_v59 }
 0x26c   : > { %v858_v60 = vpop.f32.mrf.mxu2  ;;  %v971_v61 = vpop.f32.mrf.mxu3 }
 0x26d   : > { %1037 = vst [vmem:[%s1863_s14 + $0x1e0] sm:$0xff] %v858_v60 }
 0x26e   : > { %1038 = vst [vmem:[%s1863_s14 + $0x1e8] sm:$0xff] %v971_v61 }
 0x274   : > { %v861_v62 = vpop.f32.mrf.mxu2  ;;  %v974_v63 = vpop.f32.mrf.mxu3 }
 0x275   : > { %1039 = vst [vmem:[%s1863_s14 + $0x1f0] sm:$0xff] %v861_v62 }
 0x276   : > { %1040 = vst [vmem:[%s1863_s14 + $0x1f8] sm:$0xff] %v974_v63 }
 0x277   : > { %1549 = shalt.err (!%p1546_p13)
}
 0x278   : > { %s1606_s13 = smov 256   ;;  %s1607_s14 = smov 16  }
 0x279   : > { %1301 = dma.vmem_to_hbm [thread:$0]  (%p1712_p5), %s1066_s15, 8192, %s1068_s23, %s1042_s10, %s1606_s13, %s1606_s13, %s1607_s14  }
 0x27a PF: > { %s1116_s24 = sand.u32 1, %s1584_s18   ;;  %p2049_p0 = scmp.ge.s32.totalorder %s1596_s21, 2 }
 0x27b   : > { %s1117_s29 = scalar_lea.sflag [#allocation4], %s1116_s24 }
 0x27c   : > { %p1319_p3 = pnand %p2049_p0, %p1675_p6 }
 0x27e   : > { %p1320_p7 = pneg %p1319_p3 }
 0x280   : > { %1575 = dma.done.wait (%p1320_p7), %s1117_s29, 8192  }
 0x281   : > { %1577 = vsyncadd (%p1320_p7), %s1117_s29, 4294959104  ;;  %s2050_s30 = sadd.s32 4294967294, %s1596_s21  }
 0x282   : > { %s1126_s11 = sand.u32 1, %s2050_s30  }
 0x283   : > { %s1127_s6 = scalar_lea.sflag [#allocation10], %s1126_s11 }
 0x284   : > { %1579 = dma.done.wait (%p1320_p7), %s1127_s6, 8192  }
 0x285   : > { %1581 = vsyncadd (%p1320_p7), %s1127_s6, 4294959104  ;;  %p23_p5 = scmp.ge.s32.totalorder %s1699_s16, 4   ;;  %s2051_s18 = smov %s1588_s19 }
 0x286   : > { %s2052_s19 = smov %s1592_s20  ;;  %s2053_s20 = smov %s1708_s27 }
 0x287   : > { %s2054_s21 = smov %s1699_s16  ;;  %25 = sbr.rel (!%p23_p5) target bundleno = 8 (0x8), region = 117 }
 0x28c   :  { %1143 = vsyncpa [#allocation3], 1 }
 0x28d   :  { %1145 = vsyncpa [#allocation3 + $0x1], 1 }
 0x28e   :  { %1146 = vsyncpa [#allocation6], 1 }
 0x28f   :  { %1147 = vsyncpa [#allocation4], 1 }
 0x290   :  { %1149 = vsyncpa [#allocation4 + $0x1], 1 }
 0x291   :  { %1150 = vsyncpa [#allocation10], 1 }
 0x292   :  { %1152 = vsyncpa [#allocation10 + $0x1], 1 }

</bundles_post_ra>
